<compile_context>
chip_gen: v7x
topology: tpu7x:2x2x1
jax: 0.10.0
libtpu: 0.0.40
codegen_flags: <defaults>
</compile_context>

<pallas_src>
import jax
import jax.numpy as jnp
from jax.experimental import pallas as pl
from jax.experimental.pallas import tpu as pltpu


def _awgn_kernel(std_ref, x_ref, n_ref, o_ref):
    # o = x + sqrt(N_0 / 2) * n  -- one lane-dense, unmasked store per tile.
    o_ref[...] = x_ref[...] + std_ref[0] * n_ref[...]


def _round_up(v, m):
    return ((v + m - 1) // m) * m


def complex_awgn(x, N_0, key, *, block_rows=256, block_cols=2048):
    """Apply complex AWGN with (scalar) variance N_0 to complex64 x of shape (B, S)."""
    # TODO(synk): the per-element tensor-valued N_0 branch (N_0.size() == x.size())
    # of the PyTorch forward is not implemented; only the scalar-broadcast path is.
    B, S = x.shape
    C = 2 * S

    # TODO(synk): lax.bitcast_convert_type rejects complex dtypes, so the
    # complex <-> float32 repack costs one extra XLA pass on each side instead
    # of being a free bitcast.
    slab = jnp.concatenate([jnp.real(x), jnp.imag(x)], axis=-1).astype(jnp.float32)
    # Unit-normal per real/imag component; scaled inside the kernel.
    noise = jax.random.normal(key, (B, C), dtype=jnp.float32)

    # Large, lane-dense blocks: rows a multiple of 8, cols a multiple of 128
    # (or the padded full extent for small inputs).
    bm = min(block_rows, _round_up(B, 8))
    bn = min(block_cols, _round_up(C, 128))
    Bp = _round_up(B, bm)
    Cp = _round_up(C, bn)
    if (Bp, Cp) != (B, C):
        slab = jnp.pad(slab, ((0, Bp - B), (0, Cp - C)))
        noise = jnp.pad(noise, ((0, Bp - B), (0, Cp - C)))

    # std = sqrt(N_0 / 2) per real/imag component, computed once on the host side.
    std = jnp.sqrt(jnp.asarray(N_0, dtype=jnp.float32) * jnp.float32(0.5)).reshape(1)

    out = pl.pallas_call(
        _awgn_kernel,
        out_shape=jax.ShapeDtypeStruct((Bp, Cp), jnp.float32),
        grid_spec=pltpu.PrefetchScalarGridSpec(
            num_scalar_prefetch=1,                       # std -> SMEM scalar
            grid=(Bp // bm, Cp // bn),
            in_specs=[
                pl.BlockSpec((bm, bn), lambda i, j, std: (i, j)),   # signal slab
                pl.BlockSpec((bm, bn), lambda i, j, std: (i, j)),   # unit noise
            ],
            out_specs=pl.BlockSpec((bm, bn), lambda i, j, std: (i, j)),
        ),
        compiler_params=pltpu.CompilerParams(
            # Tiles are fully independent -> shard across TensorCores on v7x;
            # neutral on single-TC v5e/v6e.
            dimension_semantics=("parallel", "parallel")),
    )(std, slab, noise)

    out = out[:B, :C]
    return jax.lax.complex(out[:, :S], out[:, S:])   # complex64


if __name__ == "__main__":
    key = jax.random.PRNGKey(0)
    kx_r, kx_i, kn = jax.random.split(key, 3)
    B, S = 16, 256
    x = jax.lax.complex(
        jax.random.normal(kx_r, (B, S), dtype=jnp.float32),
        jax.random.normal(kx_i, (B, S), dtype=jnp.float32),
    )

    N_0 = 0.1
    y = complex_awgn(x, N_0, kn)
    y = jax.block_until_ready(y)

    # Sanity checks: shape/dtype, finiteness, noise power ~ N_0.
    assert y.shape == x.shape and y.dtype == jnp.complex64
    diff = y - x
    noise_power = float(jnp.mean(jnp.abs(diff) ** 2))
    assert bool(jnp.all(jnp.isfinite(jnp.real(y))))
    assert bool(jnp.all(jnp.isfinite(jnp.imag(y))))
    assert 0.05 < noise_power < 0.2, f"unexpected noise power {noise_power}"

    print("KERNEL_OK")
</pallas_src>

<mosaic_0001>
module attributes {stable_mosaic.version = 11 : i64} {
  func.func @_awgn_kernel(%arg0: i32, %arg1: i32, %arg2: memref<1xf32, #tpu.memory_space<smem>>, %arg3: memref<16x512xf32, #tpu.memory_space<vmem>>, %arg4: memref<16x512xf32, #tpu.memory_space<vmem>>, %arg5: memref<16x512xf32, #tpu.memory_space<vmem>>) attributes {dimension_semantics = [#tpu.dimension_semantics<parallel>, #tpu.dimension_semantics<parallel>], iteration_bounds = array<i64: 1, 1>, scalar_prefetch = 1 : i64, scratch_operands = 0 : i64, tpu.core_type = #tpu.core_type<tc>, window_params = [{transform_indices = @transform_0, window_bounds = array<i64: 16, 512>}, {transform_indices = @transform_1, window_bounds = array<i64: 16, 512>}, {transform_indices = @transform_2, window_bounds = array<i64: 16, 512>}]} {
    %c0 = arith.constant 0 : index
    %c0_0 = arith.constant 0 : index
    %0 = vector.load %arg3[%c0, %c0_0] : memref<16x512xf32, #tpu.memory_space<vmem>>, vector<16x512xf32>
    %c0_1 = arith.constant 0 : index
    %1 = memref.load %arg2[%c0_1] : memref<1xf32, #tpu.memory_space<smem>>
    %c0_2 = arith.constant 0 : index
    %c0_3 = arith.constant 0 : index
    %2 = vector.load %arg4[%c0_2, %c0_3] : memref<16x512xf32, #tpu.memory_space<vmem>>, vector<16x512xf32>
    %3 = vector.broadcast %1 : f32 to vector<16x512xf32>
    %4 = arith.mulf %3, %2 : vector<16x512xf32>
    %5 = arith.addf %0, %4 : vector<16x512xf32>
    %c0_4 = arith.constant 0 : index
    %c0_5 = arith.constant 0 : index
    %6 = vector.load %arg5[%c0_4, %c0_5] : memref<16x512xf32, #tpu.memory_space<vmem>>, vector<16x512xf32>
    tpu.vector_store %arg5[%c0_4, %c0_5], %5 {strides = array<i32>} : memref<16x512xf32, #tpu.memory_space<vmem>>, vector<16x512xf32>,
    return
  }
  func.func @transform_0(%arg0: i32, %arg1: i32, %arg2: memref<1xf32, #tpu.memory_space<smem>>) -> (i32, i32) {
    %c0_i32 = arith.constant 0 : i32
    return %arg0, %arg1 : i32, i32
  }
  func.func @transform_1(%arg0: i32, %arg1: i32, %arg2: memref<1xf32, #tpu.memory_space<smem>>) -> (i32, i32) {
    %c0_i32 = arith.constant 0 : i32
    return %arg0, %arg1 : i32, i32
  }
  func.func @transform_2(%arg0: i32, %arg1: i32, %arg2: memref<1xf32, #tpu.memory_space<smem>>) -> (i32, i32) {
    %c0_i32 = arith.constant 0 : i32
    return %arg0, %arg1 : i32, i32
  }
}

</mosaic_0001>

<bundles_post_ra>
// kernel: tpu_custom_call.1
= control target key start
LH: loop header
LB: loop body
LE: loop exit
PB: predicated region body
PF: predicated region fallthrough
CT: control target
= control target key end

     0   :  { %9 = vsyncpa [#allocation5], 0  ;;  %s252_s0 = inlined_call_operand.<no memory space> [shape: f32[1], index: 0, kind: input, shape index: {}]   ;;  %s253_s1 = inlined_call_operand.hbm [shape: f32[16,512], index: 1, kind: input, shape index: {}]   ;;  %s254_s2 = inlined_call_operand.hbm [shape: f32[16,512], index: 2, kind: input, shape index: {}]   ;;  %s255_s3 = inlined_call_operand.hbm [shape: f32[16,512], index: 3, kind: output, shape index: {}]  }
   0x1   :  { %10 = vsyncpa [#allocation8], 0 }
   0x2   :  { %11 = vsyncpa [#allocation6], 0  ;;  %s179_s12 = smov [#allocation4]   ;;  %s107_s16 = scalar_lea.hbm %s253_s1, 1024 }
   0x3   :  { %s17_s13 = sshll.u32 %s179_s12, 4  ;;  %p108_p0 = scmp.ne.s32.totalorder %s253_s1, %s107_s16  ;;  %s18_s13 = int_to_ptr.vmem [resolvable:$true] %s17_s13 }
   0x4   :  { %p111_p1 = scmp.lt.u32.totalorder %s107_s16, %s253_s1 }
   0x6   :  { %p113_p2 = pnand %p111_p1, %p108_p0 }
   0x8   :  { %116 = shalt.err (!%p113_p2)
}
   0x9   :  { %s117_s21 = scalar_lea.vmem %s18_s13, 1024  ;;  %p122_p4 = scmp.lt.s32.totalorder %s18_s13, %s18_s13 }
   0xa   :  { %p118_p3 = scmp.ne.s32.totalorder %s18_s13, %s117_s21  ;;  %p123_p5 = scmp.lt.s32.totalorder %s117_s21, %s117_s21 }
   0xc   :  { %p124_p6 = por %p123_p5, %p122_p4 }
   0xe   :  { %p125_p7 = pnand %p124_p6, %p118_p3 }
  0x10   :  { %128 = shalt.err (!%p125_p7)
}
  0x11   :  { %s180_s22 = smov 512   ;;  %s181_s23 = smov 32  }
  0x12   :  { %23 = dma.hbm_to_vmem [thread:$0]  %s253_s1, 1024, %s18_s13, [#allocation5], %s180_s22, %s180_s22, %s181_s23  }
  0x13   :  { %s182_s26 = smov [#allocation7]   ;;  %s129_s30 = scalar_lea.hbm %s254_s2, 1024 }
  0x14   :  { %s29_s27 = sshll.u32 %s182_s26, 4  ;;  %p130_p8 = scmp.ne.s32.totalorder %s254_s2, %s129_s30  ;;  %s30_s27 = int_to_ptr.vmem [resolvable:$true] %s29_s27 }
  0x15   :  { %p133_p9 = scmp.lt.u32.totalorder %s129_s30, %s254_s2 }
  0x17   :  { %p135_p10 = pnand %p133_p9, %p130_p8 }
  0x19   :  { %138 = shalt.err (!%p135_p10)
}
  0x1a   :  { %s139_s8 = scalar_lea.vmem %s30_s27, 1024  ;;  %p144_p12 = scmp.lt.s32.totalorder %s30_s27, %s30_s27 }
  0x1b   :  { %p140_p11 = scmp.ne.s32.totalorder %s30_s27, %s139_s8  ;;  %p145_p13 = scmp.lt.s32.totalorder %s139_s8, %s139_s8 }
  0x1d   :  { %p146_p0 = por %p145_p13, %p144_p12 }
  0x1f   :  { %p147_p1 = pnand %p146_p0, %p140_p11 }
  0x21   :  { %150 = shalt.err (!%p147_p1)
}
  0x22   :  { %35 = dma.hbm_to_vmem [thread:$0]  %s254_s2, 1024, %s30_s27, [#allocation8], %s180_s22, %s180_s22, %s181_s23  }
  0x23   :  { %173 = dma.done.wait [#allocation5], 1024  }
  0x24   :  { %174 = vsyncadd [#allocation5], 4294966272 }
  0x25   :  { %175 = dma.done.wait [#allocation8], 1024  }
  0x26   :  { %176 = vsyncadd [#allocation8], 4294966272  ;;  %v59_v0 = vstv %s252_s0  ;;  %v42_v1 = vld [vmem:[#allocation4] sm:$0xff]  ;;  %v43_v3 = vld [vmem:[#allocation4 + $0x8] sm:$0xff]  ;;  %s183_s0 = smov [#allocation9]  }
  0x27   :  { %v51_v2 = vld [vmem:[#allocation7] sm:$0xff]  ;;  %v52_v5 = vld [vmem:[#allocation7 + $0x8] sm:$0xff]  ;;  %v44_v6 = vld [vmem:[#allocation4 + $0x10] sm:$0xff]  ;;  %s89_s2 = sshll.u32 %s183_s0, 4  ;;  %s90_s2 = int_to_ptr.vmem [resolvable:$true] %s89_s2 }
  0x28   :  { %v60_v4 = vmul.f32 %v59_v0, %v51_v2  ;;  %v53_v7 = vld [vmem:[#allocation7 + $0x10] sm:$0xff]  ;;  %v61_v8 = vmul.f32 %v59_v0, %v52_v5  ;;  %v45_v10 = vld [vmem:[#allocation4 + $0x18] sm:$0xff]  ;;  %v46_v12 = vld [vmem:[#allocation4 + $0x20] sm:$0xff]  ;;  %s151_s12 = scalar_lea.vmem %s90_s2, 1024  ;;  %p156_p3 = scmp.lt.s32.totalorder %s90_s2, %s90_s2 }
  0x29   :  { %v62_v9 = vmul.f32 %v59_v0, %v53_v7  ;;  %v54_v11 = vld [vmem:[#allocation7 + $0x18] sm:$0xff]  ;;  %v55_v15 = vld [vmem:[#allocation7 + $0x20] sm:$0xff]  ;;  %v47_v16 = vld [vmem:[#allocation4 + $0x28] sm:$0xff]  ;;  %p152_p2 = scmp.ne.s32.totalorder %s90_s2, %s151_s12  ;;  %p157_p4 = scmp.lt.s32.totalorder %s151_s12, %s151_s12 }
  0x2a   :  { %v68_v13 = vadd.f32 %v60_v4, %v42_v1  ;;  %v63_v14 = vmul.f32 %v59_v0, %v54_v11  ;;  %v56_v17 = vld [vmem:[#allocation7 + $0x28] sm:$0xff]  ;;  %v69_v18 = vadd.f32 %v61_v8, %v43_v3  ;;  %v64_v20 = vmul.f32 %v59_v0, %v55_v15  ;;  %v48_v22 = vld [vmem:[#allocation4 + $0x30] sm:$0xff]  ;;  %v49_v26 = vld [vmem:[#allocation4 + $0x38] sm:$0xff] }
  0x2b   :  { %v70_v19 = vadd.f32 %v62_v9, %v44_v6  ;;  %v65_v21 = vmul.f32 %v59_v0, %v56_v17  ;;  %v57_v23 = vld [vmem:[#allocation7 + $0x30] sm:$0xff]  ;;  %v58_v27 = vld [vmem:[#allocation7 + $0x38] sm:$0xff]  ;;  %p158_p5 = por %p157_p4, %p156_p3 }
  0x2c   :  { %76 = vst [vmem:[#allocation9] sm:$0xff] %v68_v13  ;;  %v71_v24 = vadd.f32 %v63_v14, %v45_v10  ;;  %v66_v25 = vmul.f32 %v59_v0, %v57_v23  ;;  %77 = vst [vmem:[#allocation9 + $0x8] sm:$0xff] %v69_v18  ;;  %v72_v28 = vadd.f32 %v64_v20, %v46_v12 }
  0x2d   :  { %78 = vst [vmem:[#allocation9 + $0x10] sm:$0xff] %v70_v19  ;;  %v73_v29 = vadd.f32 %v65_v21, %v47_v16  ;;  %v67_v30 = vmul.f32 %v59_v0, %v58_v27  ;;  %p159_p6 = pnand %p158_p5, %p152_p2 }
  0x2e   :  { %79 = vst [vmem:[#allocation9 + $0x18] sm:$0xff] %v71_v24  ;;  %v74_v31 = vadd.f32 %v66_v25, %v48_v22  ;;  %80 = vst [vmem:[#allocation9 + $0x20] sm:$0xff] %v72_v28 }
  0x2f   :  { %81 = vst [vmem:[#allocation9 + $0x28] sm:$0xff] %v73_v29  ;;  %v75_v32 = vadd.f32 %v67_v30, %v49_v26 }
  0x30   :  { %82 = vst [vmem:[#allocation9 + $0x30] sm:$0xff] %v74_v31 }
  0x31   :  { %83 = vst [vmem:[#allocation9 + $0x38] sm:$0xff] %v75_v32 }
  0x32   :  { %162 = shalt.err (!%p159_p6)
}
  0x33   :  { %s163_s15 = scalar_lea.hbm %s255_s3, 1024 }
  0x34   :  { %p164_p7 = scmp.ne.s32.totalorder %s255_s3, %s163_s15  ;;  %p167_p8 = scmp.lt.u32.totalorder %s163_s15, %s255_s3 }
  0x36   :  { %p169_p9 = pnand %p167_p8, %p164_p7 }
  0x38   :  { %172 = shalt.err (!%p169_p9)
}
  0x39   :  { %95 = dma.vmem_to_hbm [thread:$0]  %s90_s2, 1024, %s255_s3, [#allocation6], %s180_s22, %s180_s22, %s181_s23  }
  0x3a   :  { %177 = dma.done.wait [#allocation6], 1024  }
  0x3b   :  { %178 = vsyncadd [#allocation6], 4294966272 }
  0x3c   :  { %99 = vsyncpa [#allocation5], 1 }
  0x3d   :  { %100 = vsyncpa [#allocation8], 1 }
  0x3e   :  { %101 = vsyncpa [#allocation6], 1 }

</bundles_post_ra>
